<compile_context>
chip_gen: v7x
topology: tpu7x:2x2x1
jax: 0.10.0
libtpu: 0.0.40
codegen_flags: <defaults>
</compile_context>

<pallas_src>
import math

import jax
import jax.numpy as jnp
from jax.experimental import pallas as pl
from jax.experimental.pallas import tpu as pltpu


# Conservative budget vs. the 32 MiB default scoped VMEM limit (v6e/v7x) and
# v7x's 64 MiB per-core physical VMEM under megacore replication.
_VMEM_BUDGET_BYTES = 16 * 1024 * 1024


def _choose_token_tile(seq_len, vocab_size):
    """MXU-shaped token tile: prefer 256 (v6e/v7x 2x256x256 MXU), 128 on large-V
    to bound the (TS, VK) one-hot footprint; must divide seq_len."""
    max_ts = 256 if vocab_size <= 8192 else 128
    for ts in (256, 128, 64, 32, 16, 8):
        if ts <= max_ts and ts <= seq_len and seq_len % ts == 0:
            return ts
    return seq_len


def _vmem_footprint(vk, ts, d, table_itemsize):
    table = 2 * vk * d * table_itemsize   # streamed (VK, D) table chunk, double-buffered
    onehot = ts * vk * 4                  # f32-width one-hot MXU operand
    tiles = 4 * ts * d * 4                # acc scratch + (double-buffered) out + pe tiles
    return table + onehot + tiles


def _choose_vocab_chunk(vocab_size, d, ts, table_itemsize):
    """Largest vocab chunk whose working set fits the VMEM budget; divides V."""
    if _vmem_footprint(vocab_size, ts, d, table_itemsize) <= _VMEM_BUDGET_BYTES:
        return vocab_size  # whole table fits -> constant block index, fetched once
    for vk in (8192, 4096, 2048, 1024, 512, 256, 128):
        if vk < vocab_size and vocab_size % vk == 0 and \
                _vmem_footprint(vk, ts, d, table_itemsize) <= _VMEM_BUDGET_BYTES:
            return vk
    for vk in (128, 256, 512, 1024):   # smallest aligned divisor, even if over budget
        if vocab_size % vk == 0:
            return vk
    return vocab_size


def _embed_kernel(ids_ref, emb_ref, pe_ref, out_ref, acc_ref):
    # ids_ref: (TS, 1)  int32   -- token ids for this tile (batch dim squeezed)
    # emb_ref: (VK, D)  table   -- streamed vocab chunk, NATIVE dtype
    # pe_ref : (TS, D)  float32 -- positional-encoding tile for this token tile
    # out_ref: (TS, D)  float32 -- dense output tile (batch dim squeezed)
    # acc_ref: (TS, D)  float32 -- VMEM scratch accumulator across vocab chunks
    k = pl.program_id(2)
    nk = pl.num_programs(2)
    ts = ids_ref.shape[0]
    vk, dim = emb_ref.shape

    @pl.when(k == 0)
    def _():
        acc_ref[...] = jnp.zeros_like(acc_ref)

    ids = ids_ref[...]                                                  # (TS, 1)
    iota = jax.lax.broadcasted_iota(jnp.int32, (ts, vk), 1) + k * vk    # (TS, VK)
    # One-hot in the table's native dtype (0/1 selection is exact); f32 accumulate.
    onehot = (iota == ids).astype(emb_ref.dtype)                        # (TS, VK)
    acc_ref[...] += jnp.dot(onehot, emb_ref[...],
                            preferred_element_type=jnp.float32)         # (TS, D)

    @pl.when(k == nk - 1)
    def _():
        out_ref[...] = (acc_ref[...] * jnp.float32(math.sqrt(dim))
                        + pe_ref[...]).astype(out_ref.dtype)


def word_sinusoidal_pos_embedding(src, emb_table, pe_full, *, vocab_chunk=None):
    """src: (B, S) int ids; emb_table: (V, D); pe_full: (max_seq_len, D). Returns (B, S, D) f32."""
    B, S = src.shape
    V, D = emb_table.shape
    assert S <= pe_full.shape[0], "sequence longer than max_seq_length"

    TS = _choose_token_tile(S, V)
    if vocab_chunk is None:
        VK = _choose_vocab_chunk(V, D, TS, emb_table.dtype.itemsize)
    else:
        assert V % vocab_chunk == 0
        VK = vocab_chunk
    num_vk = pl.cdiv(V, VK)

    ids = src.astype(jnp.int32).reshape(B, S, 1)   # (TS, 1) id tiles -> no in-kernel relayout
    pe = pe_full[:S].astype(jnp.float32)           # (S, D); equiv. to pe[:S].transpose(0,1) bcast

    return pl.pallas_call(
        _embed_kernel,
        out_shape=jax.ShapeDtypeStruct((B, S, D), jnp.float32),
        grid=(B, S // TS, num_vk),
        in_specs=[
            # one TS-token id tile per (b, s) step (batch dim squeezed), reused over k
            pl.BlockSpec((None, TS, 1), lambda b, s, k: (b, s, 0)),
            # streamed (VK, D) table chunk; constant index (fetched once) when VK == V
            pl.BlockSpec((VK, D), lambda b, s, k: (k, 0)),
            # per-tile PE block -- only TS*D bytes resident, pipelined with compute
            pl.BlockSpec((TS, D), lambda b, s, k: (s, 0)),
        ],
        # same out block across k -> accumulator pattern, written at the last chunk
        out_specs=pl.BlockSpec((None, TS, D), lambda b, s, k: (b, s, 0)),
        scratch_shapes=[pltpu.VMEM((TS, D), jnp.float32)],
        compiler_params=pltpu.CompilerParams(
            dimension_semantics=("parallel", "parallel", "arbitrary")),
    )(ids, emb_table, pe)


def make_sinusoidal_pe(max_seq_length, emb_size):
    """Matches the PyTorch buffer construction (before the unsqueeze)."""
    position = jnp.arange(max_seq_length, dtype=jnp.float32)[:, None]
    div_term = jnp.exp(
        jnp.arange(0, emb_size, 2, dtype=jnp.float32) * -(math.log(10000.0) / emb_size)
    )
    pe = jnp.zeros((max_seq_length, emb_size), dtype=jnp.float32)
    pe = pe.at[:, 0::2].set(jnp.sin(position * div_term))
    pe = pe.at[:, 1::2].set(jnp.cos(position * div_term))
    return pe


if __name__ == "__main__":
    # Small, deterministic synthetic setup (args.emb_size=32, args.max_seq_length=16, vocab=64).
    B, S = 2, 8
    vocab_size, emb_size, max_seq_length = 64, 32, 16

    key = jax.random.PRNGKey(0)
    k_emb, k_src = jax.random.split(key)
    emb_table = jax.random.normal(k_emb, (vocab_size, emb_size), dtype=jnp.float32)
    src = jax.random.randint(k_src, (B, S), 0, vocab_size, dtype=jnp.int32)
    pe_full = make_sinusoidal_pe(max_seq_length, emb_size)

    # Pure-JAX reference (eval-mode dropout == identity).
    ref = emb_table[src] * math.sqrt(emb_size) + pe_full[:S][None, :, :]

    # Path 1: whole table VMEM-resident (VK == V, constant block index).
    out = jax.block_until_ready(word_sinusoidal_pos_embedding(src, emb_table, pe_full))
    assert out.shape == (B, S, emb_size)
    assert jnp.allclose(out, ref, atol=1e-5, rtol=1e-5)

    # Path 2: streamed vocab chunks (exercises the accumulator / large-vocab path).
    out_chunked = jax.block_until_ready(
        word_sinusoidal_pos_embedding(src, emb_table, pe_full, vocab_chunk=16))
    assert jnp.allclose(out_chunked, ref, atol=1e-5, rtol=1e-5)

    print("KERNEL_OK")
</pallas_src>

<mosaic_0001>
module attributes {stable_mosaic.version = 11 : i64} {
  func.func @_embed_kernel(%arg0: i32, %arg1: i32, %arg2: i32, %arg3: memref<1x8x1xi32, #tpu.memory_space<vmem>>, %arg4: memref<64x32xf32, #tpu.memory_space<vmem>>, %arg5: memref<8x32xf32, #tpu.memory_space<vmem>>, %arg6: memref<1x8x32xf32, #tpu.memory_space<vmem>>, %arg7: memref<8x32xf32, #tpu.memory_space<vmem>>) attributes {dimension_semantics = [#tpu.dimension_semantics<parallel>, #tpu.dimension_semantics<parallel>, #tpu.dimension_semantics<arbitrary>], iteration_bounds = array<i64: 2, 1, 1>, scalar_prefetch = 0 : i64, scratch_operands = 1 : i64, tpu.core_type = #tpu.core_type<tc>, window_params = [{transform_indices = @transform_0, window_bounds = array<i64: 1, 8, 1>}, {transform_indices = @transform_1, window_bounds = array<i64: 64, 32>}, {transform_indices = @transform_2, window_bounds = array<i64: 8, 32>}, {transform_indices = @transform_3, window_bounds = array<i64: 1, 8, 32>}]} {
    %c0_i32 = arith.constant 0 : i32
    %0 = arith.cmpi eq, %arg2, %c0_i32 : i32
    %1 = arith.extui %0 : i1 to i32
    %c0_i32_0 = arith.constant 0 : i32
    %2 = arith.cmpi ne, %1, %c0_i32_0 : i32
    scf.if %2 {
      %cst_11 = arith.constant 0.000000e+00 : f32
      %21 = vector.broadcast %cst_11 : f32 to vector<8x32xf32>
      %c0_12 = arith.constant 0 : index
      %c0_13 = arith.constant 0 : index
      %22 = vector.load %arg7[%c0_12, %c0_13] : memref<8x32xf32, #tpu.memory_space<vmem>>, vector<8x32xf32>
      tpu.vector_store %arg7[%c0_12, %c0_13], %21 {strides = array<i32>} : memref<8x32xf32, #tpu.memory_space<vmem>>, vector<8x32xf32>,
    } else {
    }
    %c0 = arith.constant 0 : index
    %c0_1 = arith.constant 0 : index
    %c0_2 = arith.constant 0 : index
    %3 = vector.load %arg3[%c0, %c0_1, %c0_2] : memref<1x8x1xi32, #tpu.memory_space<vmem>>, vector<1x8x1xi32>
    %4 = vector.shape_cast %3 : vector<1x8x1xi32> to vector<8x1xi32>
    %5 = tpu.iota {dimensions = array<i32: 1>} : vector<8x64xi32>
    %c64_i32 = arith.constant 64 : i32
    %6 = arith.muli %arg2, %c64_i32 : i32
    %7 = vector.broadcast %6 : i32 to vector<8x64xi32>
    %8 = arith.addi %5, %7 : vector<8x64xi32>
    %9 = vector.broadcast %4 : vector<8x1xi32> to vector<8x64xi32>
    %10 = arith.cmpi eq, %8, %9 : vector<8x64xi32>
    %11 = arith.extui %10 : vector<8x64xi1> to vector<8x64xi32>
    %12 = arith.sitofp %11 : vector<8x64xi32> to vector<8x64xf32>
    %c0_3 = arith.constant 0 : index
    %c0_4 = arith.constant 0 : index
    %13 = vector.load %arg7[%c0_3, %c0_4] : memref<8x32xf32, #tpu.memory_space<vmem>>, vector<8x32xf32>
    %c0_5 = arith.constant 0 : index
    %c0_6 = arith.constant 0 : index
    %14 = vector.load %arg4[%c0_5, %c0_6] : memref<64x32xf32, #tpu.memory_space<vmem>>, vector<64x32xf32>
    %cst = arith.constant dense<0.000000e+00> : vector<8x32xf32>
    %15 = tpu.matmul %12, %14, %cst {dimension_numbers = #tpu.dot_dimension_numbers<[1], [0], [0], [1], [0, 0, 1, 1], [], []>} : vector<8x64xf32>, vector<64x32xf32>, vector<8x32xf32> -> vector<8x32xf32>
    %16 = arith.addf %13, %15 : vector<8x32xf32>
    %c0_7 = arith.constant 0 : index
    %c0_8 = arith.constant 0 : index
    %17 = vector.load %arg7[%c0_7, %c0_8] : memref<8x32xf32, #tpu.memory_space<vmem>>, vector<8x32xf32>
    tpu.vector_store %arg7[%c0_7, %c0_8], %16 {strides = array<i32>} : memref<8x32xf32, #tpu.memory_space<vmem>>, vector<8x32xf32>,
    %c0_i32_9 = arith.constant 0 : i32
    %18 = arith.cmpi eq, %arg2, %c0_i32_9 : i32
    %19 = arith.extui %18 : i1 to i32
    %c0_i32_10 = arith.constant 0 : i32
    %20 = arith.cmpi ne, %19, %c0_i32_10 : i32
    scf.if %20 {
      %c0_11 = arith.constant 0 : index
      %c0_12 = arith.constant 0 : index
      %21 = vector.load %arg7[%c0_11, %c0_12] : memref<8x32xf32, #tpu.memory_space<vmem>>, vector<8x32xf32>
      %cst_13 = arith.constant 5.65685415 : f32
      %22 = vector.broadcast %cst_13 : f32 to vector<8x32xf32>
      %23 = arith.mulf %21, %22 : vector<8x32xf32>
      %c0_14 = arith.constant 0 : index
      %c0_15 = arith.constant 0 : index
      %24 = vector.load %arg5[%c0_14, %c0_15] : memref<8x32xf32, #tpu.memory_space<vmem>>, vector<8x32xf32>
      %25 = arith.addf %23, %24 : vector<8x32xf32>
      %c0_16 = arith.constant 0 : index
      %c0_17 = arith.constant 0 : index
      %c0_18 = arith.constant 0 : index
      %26 = vector.load %arg6[%c0_16, %c0_17, %c0_18] : memref<1x8x32xf32, #tpu.memory_space<vmem>>, vector<1x8x32xf32>
      %27 = vector.shape_cast %26 : vector<1x8x32xf32> to vector<8x32xf32>
      %28 = vector.shape_cast %25 : vector<8x32xf32> to vector<1x8x32xf32>
      tpu.vector_store %arg6[%c0_16, %c0_17, %c0_18], %28 {strides = array<i32>} : memref<1x8x32xf32, #tpu.memory_space<vmem>>, vector<1x8x32xf32>,
    } else {
    }
    return
  }
  func.func @transform_0(%arg0: i32, %arg1: i32, %arg2: i32) -> (i32, i32, i32) {
    %c0_i32 = arith.constant 0 : i32
    %c0_i32_0 = arith.constant 0 : i32
    return %arg0, %arg1, %c0_i32 : i32, i32, i32
  }
  func.func @transform_1(%arg0: i32, %arg1: i32, %arg2: i32) -> (i32, i32) {
    %c0_i32 = arith.constant 0 : i32
    %c0_i32_0 = arith.constant 0 : i32
    return %arg2, %c0_i32 : i32, i32
  }
  func.func @transform_2(%arg0: i32, %arg1: i32, %arg2: i32) -> (i32, i32) {
    %c0_i32 = arith.constant 0 : i32
    %c0_i32_0 = arith.constant 0 : i32
    return %arg1, %c0_i32 : i32, i32
  }
  func.func @transform_3(%arg0: i32, %arg1: i32, %arg2: i32) -> (i32, i32, i32) {
    %c0_i32 = arith.constant 0 : i32
    %c0_i32_0 = arith.constant 0 : i32
    return %arg0, %arg1, %c0_i32 : i32, i32, i32
  }
}

</mosaic_0001>

<bundles_post_ra>
// kernel: tpu_custom_call.1
= control target key start
LH: loop header
LB: loop body
LE: loop exit
PB: predicated region body
PF: predicated region fallthrough
CT: control target
= control target key end

     0   :  { %8 = vsyncpa [#allocation4], 0  ;;  %s830_s0 = inlined_call_operand.vmem [shape: s32[2,8,1], index: 0, kind: input, shape index: {}]   ;;  %s831_s1 = inlined_call_operand.vmem [shape: f32[64,32], index: 1, kind: input, shape index: {}]   ;;  %s832_s2 = inlined_call_operand.vmem [shape: f32[8,32], index: 2, kind: input, shape index: {}]   ;;  %s833_s3 = inlined_call_operand.hbm [shape: f32[2,8,32], index: 3, kind: output, shape index: {}]  }
   0x1   :  { %10 = vsyncpa [#allocation4 + $0x1], 0  ;;  %s688_s12 = smov 0   ;;  %s690_s13 = smov 0  }
   0x2   :  { %s692_s14 = smov 0   ;;  %s694_s15 = smov 0  }
   0x3   :  { %s696_s16 = smov 0   ;;  %s698_s17 = smov 0  }
   0x4 LB: > { %s468_s18 = sadd.s32 4294967295, %s661_s17   ;;  %s469_s19 = sadd.s32 4294967294, %s661_s17   ;;  %s661_s17 = sphi %s698_s17, %s16_s17   ;;  %s657_s16 = sphi %s696_s16, %s840_s16   ;;  %s653_s15 = sphi %s694_s15, %s839_s15   ;;  %s649_s14 = sphi %s692_s14, %s838_s14   ;;  %s645_s13 = sphi %s690_s13, %s837_s13   ;;  %s641_s12 = sphi %s688_s12, %s836_s12  }
   0x5   : > { %s35_s20 = sadd.s32 1, %s657_s16  ;;  %s124_s21 = sadd.s32 1, %s649_s14 }
   0x6   : > { %p37_p0 = scmp.ge.s32.totalorder %s35_s20, 2  ;;  %p134_p1 = scmp.ne.s32.totalorder %s649_s14, %s645_s13 }
   0x7   : > { %p135_p2 = scmp.eq.s32.totalorder %s468_s18, 1  ;;  %p140_p3 = scmp.ne.s32.totalorder %s645_s13, %s641_s12 }
   0x8   : > { %s842_s20 = smov (%p37_p0, %s35_s20), 0  ;;  %p141_p5 = scmp.eq.s32.totalorder %s469_s19, 1 }
   0x9   : > { %p728_p4 = por %p135_p2, %p134_p1  ;;  %s119_s23 = ssub.s32 %s657_s16, %s842_s20 }
   0xa   : > { %p474_p6 = scmp.ge.s32.totalorder %s661_s17, 1  ;;  %p122_p7 = scmp.eq.s32.totalorder %s119_s23, 0 }
   0xb   : > { %p735_p8 = por %p141_p5, %p140_p3  ;;  %p185_p9 = scmp.lt.s32.totalorder %s661_s17, 3 }
   0xc   : > { %s741_s25 = scalar_select %p122_p7, %s649_s14, %s124_s21  }
   0xd   : > { %p186_p10 = pnand %p474_p6, %p185_p9 }
   0xe   : > { %p220_p11 = scmp.lt.s32.totalorder (!%p186_p10), %s653_s15, 1  ;;  %v256_v0 = vld [vmem:[%s831_s1] sm:$0xff] (!%p186_p10)  ;;  %v257_v1 = vld [vmem:[%s831_s1 + $0x8] sm:$0xff] (!%p186_p10)  ;;  %v258_v2 = vld [vmem:[%s831_s1 + $0x10] sm:$0xff] (!%p186_p10)  ;;  %v663_v3 = vmov (!%p186_p10), 0   ;;  %v664_v4 = vmov (!%p186_p10), 0.0|0.0   ;;  %v244_v16 = vlaneseq (!%p186_p10) }
   0xf   : > { %189 = sbr.rel (%p186_p10) target bundleno = 397 (0x18d), region = 32  ;;  %582 = vset.pattern.permute.xlu0 (!%p186_p10), %v663_v3  ;;  %511 = vmatprep.subr.bf16.mxu0 (!%p186_p10), %v664_v4  ;;  %v512_v5 = vpack.c.bf16 (!%p186_p10), %v257_v1, %v256_v0  ;;  %v259_v6 = vld [vmem:[%s831_s1 + $0x18] sm:$0xff] (!%p186_p10)  ;;  %v260_v8 = vld [vmem:[%s831_s1 + $0x20] sm:$0xff] (!%p186_p10)  ;;  %v261_v9 = vld [vmem:[%s831_s1 + $0x28] sm:$0xff] (!%p186_p10)  ;;  %vm665_vm0 = vmmov (!%p186_p10), 0   ;;  %v666_v14 = vmov (!%p186_p10), 0.0  }
  0x10   : > { %v515_v7 = vpack.c.bf16 (!%p186_p10), %v259_v6, %v258_v2  ;;  %v518_v11 = vpack.c.bf16 (!%p186_p10), %v261_v9, %v260_v8  ;;  %v262_v12 = vld [vmem:[%s831_s1 + $0x30] sm:$0xff] (!%p186_p10)  ;;  %v263_v13 = vld [vmem:[%s831_s1 + $0x38] sm:$0xff] (!%p186_p10)  ;;  %508 = vmatprep.mubr.msk.f32.mxu0 (!%p186_p10), %vm665_vm0, %v666_v14  ;;  %vm241_vm1 = vcmask (!%p186_p10), 261120   ;;  %v245_v17 = vand.u32 (!%p186_p10), 127, %v244_v16  ;;  %s217_s30 = sand.u32 (!%p186_p10), 1, %s645_s13   ;;  %v346_v25 = vld [vmem:[%s832_s2] sm:$0xff] (!%p186_p10) }
  0x11   : > { %513 = vmatpush3.bf16.msra.mxu0 (!%p186_p10), %v512_v5  ;;  %242 = vst.msk [vmem:[#allocation2] sm:$0xff] (!%p186_p10), %vm241_vm1, %v666_v14  ;;  %v521_v15 = vpack.c.bf16 (!%p186_p10), %v263_v13, %v262_v12  ;;  %vm264_vm2 = vcmask (!%p186_p10), 523264   ;;  %s475_s4 = sshll.u32 (!%p186_p10), %s217_s30, 3  ;;  %s350_s19 = scalar_lea.sflag (!%p186_p10), [#allocation4], %s217_s30 }
  0x12   : > { %514 = vmatprep.subr.bf16.mxu0 (!%p186_p10), %v664_v4 }
  0x15   : > { %516 = vmatpush3.bf16.msra.mxu0 (!%p186_p10), %v515_v7 }
  0x16   : > { %s221_s7 = scalar_select %p220_p11, %s653_s15, 1  ;;  %517 = vmatprep.subr.bf16.mxu0 %v664_v4 }
  0x18   : > { %s476_s8 = sshll.u32 %s221_s7, 3  ;;  %v255_v20 = vld [vmem:[#allocation2] sm:$0xff]  ;;  %s480_s7 = sshll.u32 %s653_s15, 7 }
  0x19   : > { %s226_s23 = scalar_lea.vmem %s830_s0, %s476_s8  ;;  %519 = vmatpush3.bf16.msra.mxu0 %v518_v11  ;;  %s219_s8 = scalar_lea.vmem [#allocation3], %s475_s4 }
  0x1a   : > { %v243_v10 = vld [vmem:[%s226_s23] sm:$0xff]  ;;  %520 = vmatprep.subr.bf16.mxu0 %v664_v4  ;;  %s364_s9 = sshll.u32 %s219_s8, 4  ;;  %s782_s18 = scalar_lea.hbm %s833_s3, %s480_s7  ;;  %s784_s9 = int_to_ptr.vmem [resolvable:$true] %s364_s9 }
  0x1b   : > { %250 = vperm.xlu0 %582, %v243_v10   ;;  %s583_s21 = scalar_lea.vmem %s784_s9, 128  ;;  %s667_s15 = smov [#allocation3]  }
  0x1c   : > { %p584_p12 = scmp.ne.s32.totalorder %s784_s9, %s583_s21  ;;  %s587_s23 = sshll.u32 %s667_s15, 4  ;;  %s588_s23 = int_to_ptr.vmem [resolvable:$false] %s587_s23 }
  0x1d   : > { %522 = vmatpush3.bf16.msra.mxu0 %v521_v15  ;;  %s589_s26 = scalar_lea.vmem %s588_s23, 256  ;;  %p590_p1 = scmp.lt.s32.totalorder %s784_s9, %s588_s23 }
  0x1e   : > { %p585_p13 = pnand %p584_p12, %p728_p4  ;;  %p591_p2 = scmp.lt.s32.totalorder %s589_s26, %s583_s21 }
  0x20   : > { %p586_p0 = pneg %p585_p13  ;;  %p592_p3 = por %p591_p2, %p590_p1 }
  0x22   : > { %p593_p5 = pnand %p592_p3, %p586_p0 }
  0x9a   : > { %v251_v18 = vpop.permute.xlu0 %250 }
  0x9b   : > { %vm252_vm3 = vcmp.eq.s32.totalorder %v245_v17, %v251_v18 }
  0x9c   : > { %v477_v19 = vsel %vm252_vm3, 1.0, %v666_v14 }
  0x9d   : > { %509 = vmatmul.mubr.msk.f32.vlgmr.msra.gmra.mrb[0].mxu0 %vm264_vm2, %v477_v19 }
 0x170   : > { %v334_v21 = vpop.f32.mrb[0].mxu0 }
 0x171   : > { %v338_v22 = vadd.f32 %v334_v21, %v255_v20  ;;  %v510_v23 = vpop.f32.mrb[1].mxu0 }
 0x173   : > { %340 = vst.msk [vmem:[#allocation2] sm:$0xff] %vm241_vm1, %v338_v22 }
 0x17a   : > { %v344_v24 = vld [vmem:[#allocation2] sm:$0xff] }
 0x17b   : > { %v345_v26 = vmul.f32 5.656854, %v344_v24 }
 0x17d   : > { %v347_v27 = vadd.f32 %v346_v25, %v345_v26 }
 0x17f   : > { %348 = vst.msk [vmem:[%s219_s8] sm:$0xff] %vm241_vm1, %v347_v27 }
 0x180   : > { %596 = shalt.err (!%p593_p5)
}
 0x181   : > { %s597_s27 = scalar_lea.hbm %s782_s18, 128  ;;  %s601_s30 = scalar_lea.hbm %s833_s3, 256 }
 0x182   : > { %p598_p6 = scmp.ne.s32.totalorder %s782_s18, %s597_s27  ;;  %p602_p10 = scmp.lt.u32.totalorder %s782_s18, %s833_s3 }
 0x183   : > { %p603_p11 = scmp.lt.u32.totalorder %s601_s30, %s597_s27  ;;  %p605_p13 = scmp.lt.u32.totalorder %s597_s27, %s782_s18 }
 0x184   : > { %p599_p7 = pnand %p598_p6, %p728_p4 }
 0x185   : > { %p604_p12 = por %p603_p11, %p602_p10 }
 0x186   : > { %p600_p9 = pneg %p599_p7 }
 0x187   : > { %p606_p0 = por %p605_p13, %p604_p12 }
 0x189   : > { %p607_p1 = pnand %p606_p0, %p600_p9 }
 0x18b   : > { %610 = shalt.err (!%p607_p1)
}
 0x18c   : > { %523 = dma.vmem_to_hbm [thread:$0]  (%p728_p4), %s784_s9, 128, %s782_s18, %s350_s19  }
 0x18d PF: > { %p529_p2 = scmp.ge.s32.totalorder %s661_s17, 2  ;;  %s376_s6 = sand.u32 1, %s641_s12  }
 0x18e   : > { %s377_s7 = scalar_lea.sflag [#allocation4], %s376_s6 }
 0x18f   : > { %p526_p3 = pnand %p529_p2, %p735_p8 }
 0x191   : > { %636 = dma.done.wait (!%p526_p3), %s377_s7, 128  }
 0x192   : > { %638 = vsyncadd (!%p526_p3), %s377_s7, 4294967168  ;;  %s16_s17 = sadd.s32 1, %s661_s17   ;;  %s836_s12 = smov %s645_s13 }
 0x193   : > { %p13_p5 = scmp.ge.s32.totalorder %s16_s17, 4   ;;  %s837_s13 = smov %s649_s14 }
 0x194   : > { %s838_s14 = smov %s741_s25  ;;  %s839_s15 = smov %s657_s16 }
 0x195   : > { %s840_s16 = smov %s842_s20  ;;  %15 = sbr.rel (!%p13_p5) target bundleno = 4 (0x4), region = 81 }
 0x19c   :  { %382 = vsyncpa [#allocation4], 1 }
 0x19d   :  { %384 = vsyncpa [#allocation4 + $0x1], 1 }

</bundles_post_ra>
